<compile_context>
chip_gen: v5e
topology: v5e:2x2
jax: 0.10.0
libtpu: 0.0.40
codegen_flags: <defaults>
</compile_context>

<pallas_src>
import math

import jax
import jax.numpy as jnp
from jax.experimental import pallas as pl
from jax.experimental.pallas import tpu as pltpu

MIB = 1024 * 1024


def _round_up(x: int, m: int) -> int:
    return (x + m - 1) // m * m


def _cdiv(a: int, b: int) -> int:
    return (a + b - 1) // b


def _block_spec(shape, index_map, *, single_buffer=False):
    """BlockSpec; optionally single-buffered (for blocks whose index never changes)."""
    if single_buffer:
        return pl.BlockSpec(shape, index_map, pipeline_mode=pl.Buffered(1))
    return pl.BlockSpec(shape, index_map)


# ---------------------------------------------------------------------------
# Kernels
# ---------------------------------------------------------------------------

def _ffn_kernel_resident(x_ref, w1_ref, b1_ref, w2_ref, b2_ref, o_ref):
    """Whole hidden dim resident in VMEM: one fused Linear->ReLU->Linear pass."""
    h = jnp.dot(x_ref[...], w1_ref[...], preferred_element_type=jnp.float32)
    h = jnp.maximum(h + b1_ref[...], 0.0)          # bias + ReLU in f32 on the VPU
    # TODO(synk): training-mode dropout (pltpu.prng_seed / prng_random_bits with a
    # tile-dependent seed) omitted; nn.Dropout is the identity in eval mode.
    out = jnp.dot(h.astype(w2_ref.dtype), w2_ref[...],
                  preferred_element_type=jnp.float32)
    o_ref[...] = (out + b2_ref[...]).astype(o_ref.dtype)


def _ffn_kernel_chunked(x_ref, w1_ref, b1_ref, w2_ref, b2_ref, o_ref, *acc):
    """Hidden dim chunked on the inner grid axis; partial sums accumulated in f32.

    For f32 outputs there is no scratch: partials accumulate directly into the
    VMEM-resident output tile (written back to HBM only when the row tile changes).
    """
    acc_ref = acc[0] if acc else o_ref
    k = pl.program_id(1)

    h = jnp.dot(x_ref[...], w1_ref[...], preferred_element_type=jnp.float32)
    h = jnp.maximum(h + b1_ref[...], 0.0)
    partial = jnp.dot(h.astype(w2_ref.dtype), w2_ref[...],
                      preferred_element_type=jnp.float32)

    @pl.when(k == 0)
    def _():                       # first chunk writes -> no separate zero-init pass
        acc_ref[...] = partial

    @pl.when(k > 0)
    def _():
        acc_ref[...] += partial

    @pl.when(k == pl.num_programs(1) - 1)
    def _():
        o_ref[...] = (acc_ref[...] + b2_ref[...]).astype(o_ref.dtype)


# ---------------------------------------------------------------------------
# VMEM budgeting / tile selection
# ---------------------------------------------------------------------------

def _vmem_budget_bytes() -> int:
    """~80% of physical VMEM (~51 MiB on v7x, ~102 MiB on v5e/v6e)."""
    try:
        cap = pltpu.get_tpu_info().vmem_capacity_bytes
    except Exception:
        cap = 64 * MIB             # conservative fallback, safe on every generation
    return int(cap * 0.8)


def _resident_vmem_bytes(tile_m, e_pad, h_pad, out_itemsize):
    x = 2 * tile_m * e_pad * 2                       # bf16 x tile, double-buffered
    w = 2 * e_pad * h_pad * 2                        # W1 + W2 bf16, one copy each
    b = (h_pad + e_pad) * 4
    out = 2 * tile_m * e_pad * out_itemsize
    tmp = tile_m * h_pad * 4 + tile_m * e_pad * 4    # f32 hidden + f32 pre-cast out
    return x + w + b + out + tmp


def _chunked_vmem_bytes(tile_m, tile_h, e_pad, out_itemsize, use_scratch):
    x = 2 * tile_m * e_pad * 2
    w = 2 * (e_pad * tile_h + tile_h * e_pad) * 2    # double-buffered W1/W2 chunks
    b = 2 * tile_h * 4 + e_pad * 4
    out = 2 * tile_m * e_pad * out_itemsize
    acc = tile_m * e_pad * 4 if use_scratch else 0
    tmp = tile_m * tile_h * 4 + tile_m * e_pad * 4
    return x + w + b + out + acc + tmp


# ---------------------------------------------------------------------------
# Wrapper
# ---------------------------------------------------------------------------

def prepare_params(w1, b1, w2, b2):
    """One-time (per model) bf16 cast + 128-lane padding of the FFN parameters."""
    E, H = w1.shape
    assert w2.shape == (H, E) and b1.shape == (H,) and b2.shape == (E,)
    e_pad = _round_up(E, 128)
    h_pad = _round_up(H, 128)
    w1p = jnp.pad(w1.astype(jnp.bfloat16), ((0, e_pad - E), (0, h_pad - H)))
    w2p = jnp.pad(w2.astype(jnp.bfloat16), ((0, h_pad - H), (0, e_pad - E)))
    b1p = jnp.pad(b1.astype(jnp.float32), ((0, h_pad - H),)).reshape(1, h_pad)
    b2p = jnp.pad(b2.astype(jnp.float32), ((0, e_pad - E),)).reshape(1, e_pad)
    return {"w1": w1p, "b1": b1p, "w2": w2p, "b2": b2p}


def feed_forward(x, params, *, tile_m=None, tile_h=None):
    """Eval-mode FeedForward: relu(x @ W1 + b1) @ W2 + b2.   x: (..., E)."""
    w1p, b1p, w2p, b2p = params["w1"], params["b1"], params["w2"], params["b2"]
    e_pad, h_pad = w1p.shape
    *lead, E = x.shape
    M = math.prod(lead) if lead else 1
    assert E <= e_pad and w2p.shape == (h_pad, e_pad)
    assert e_pad % 128 == 0 and h_pad % 128 == 0

    out_dtype = x.dtype
    out_itemsize = jnp.dtype(out_dtype).itemsize
    budget = _vmem_budget_bytes()

    # ---- row (M) tile: large, multiple of 16, >= 2 tiles when M allows (v7x 2 TCs)
    if tile_m is None:
        tile_m = min(1024 if budget > 80 * MIB else 512, _round_up(M, 16))
        if M > 16 and _cdiv(M, tile_m) < 2:
            tile_m = max(16, _round_up(_cdiv(M, 2), 16))
    tile_m = max(16, _round_up(int(tile_m), 16))

    # ---- hidden (H) tiling: keep the full weights VMEM-resident when they fit
    force_chunked = tile_h is not None and tile_h < h_pad
    resident = (not force_chunked and
                _resident_vmem_bytes(tile_m, e_pad, h_pad, out_itemsize) <= budget)
    if not force_chunked and not resident and tile_m > 256:
        # residency is worth more than a huge row tile: retry with tile_m = 256
        if _resident_vmem_bytes(256, e_pad, h_pad, out_itemsize) <= budget:
            tile_m, resident = 256, True

    use_scratch = out_dtype != jnp.float32         # f32 outputs accumulate in-place
    if resident:
        tile_h = h_pad
    else:
        th = 512 if tile_h is None else int(tile_h)
        th = max(128, min(_round_up(th, 128), h_pad))
        cands = [c for c in range(th, 127, -128) if h_pad % c == 0]
        th = next((c for c in cands
                   if _chunked_vmem_bytes(tile_m, c, e_pad, out_itemsize,
                                          use_scratch) <= budget), cands[-1])
        while (_chunked_vmem_bytes(tile_m, th, e_pad, out_itemsize, use_scratch)
               > budget and tile_m > 16):
            tile_m = max(16, _round_up(tile_m // 2, 16))
        tile_h = th

    m_pad = _round_up(M, tile_m)

    # ---- per-call input prep (only pad when actually unaligned)
    xf = x.reshape(M, E).astype(jnp.bfloat16)
    if m_pad != M or e_pad != E:
        xf = jnp.pad(xf, ((0, m_pad - M), (0, e_pad - E)))

    flops = 4 * m_pad * e_pad * h_pad              # two matmuls, 2*M*N*K each

    if resident:
        kernel = _ffn_kernel_resident
        grid = (m_pad // tile_m,)
        dim_sem = ("parallel",)
        scratch_shapes = []
        bytes_accessed = (m_pad * e_pad * 2                       # x (bf16)
                          + e_pad * h_pad * 2 + h_pad * 4         # W1 + b1 (once)
                          + h_pad * e_pad * 2 + e_pad * 4         # W2 + b2 (once)
                          + m_pad * e_pad * out_itemsize)         # output
        vmem_needed = _resident_vmem_bytes(tile_m, e_pad, h_pad, out_itemsize)
    else:
        kernel = _ffn_kernel_chunked
        grid = (m_pad // tile_m, h_pad // tile_h)
        dim_sem = ("parallel", "arbitrary")
        scratch_shapes = ([pltpu.VMEM((tile_m, e_pad), jnp.float32)]
                          if use_scratch else [])
        n_row_tiles = m_pad // tile_m
        bytes_accessed = (m_pad * e_pad * 2                       # x: once per row tile
                          + n_row_tiles * (e_pad * h_pad * 2 + h_pad * 4
                                           + h_pad * e_pad * 2)   # W1/b1/W2 re-streamed
                          + e_pad * 4
                          + m_pad * e_pad * out_itemsize)
        vmem_needed = _chunked_vmem_bytes(tile_m, tile_h, e_pad, out_itemsize,
                                          use_scratch)

    vmem_limit = int(min(budget, max(2 * vmem_needed, 32 * MIB)))

    def _build_and_call(single_buffer_constants: bool):
        sb = single_buffer_constants
        if resident:
            # Constant index maps: each weight/bias is DMA'd from HBM exactly once;
            # single-buffering them avoids wasting VMEM on a never-refetched copy.
            in_specs = [
                pl.BlockSpec((tile_m, e_pad), lambda i: (i, 0)),
                _block_spec((e_pad, h_pad), lambda i: (0, 0), single_buffer=sb),
                _block_spec((1, h_pad),     lambda i: (0, 0), single_buffer=sb),
                _block_spec((h_pad, e_pad), lambda i: (0, 0), single_buffer=sb),
                _block_spec((1, e_pad),     lambda i: (0, 0), single_buffer=sb),
            ]
            out_specs = pl.BlockSpec((tile_m, e_pad), lambda i: (i, 0))
        else:
            in_specs = [
                pl.BlockSpec((tile_m, e_pad), lambda i, k: (i, 0)),
                pl.BlockSpec((e_pad, tile_h), lambda i, k: (0, k)),
                pl.BlockSpec((1, tile_h),     lambda i, k: (0, k)),
                pl.BlockSpec((tile_h, e_pad), lambda i, k: (k, 0)),
                _block_spec((1, e_pad),       lambda i, k: (0, 0), single_buffer=sb),
            ]
            out_specs = pl.BlockSpec((tile_m, e_pad), lambda i, k: (i, 0))
        return pl.pallas_call(
            kernel,
            out_shape=jax.ShapeDtypeStruct((m_pad, e_pad), out_dtype),
            grid_spec=pltpu.PrefetchScalarGridSpec(
                num_scalar_prefetch=0,
                grid=grid,
                in_specs=in_specs,
                out_specs=out_specs,
                scratch_shapes=scratch_shapes,
            ),
            compiler_params=pltpu.CompilerParams(
                dimension_semantics=dim_sem,
                vmem_limit_bytes=vmem_limit,
            ),
            cost_estimate=pl.CostEstimate(
                flops=int(flops), transcendentals=0,
                bytes_accessed=int(bytes_accessed)),
        )(xf, w1p, b1p, w2p, b2p)

    try:
        out = _build_and_call(True)
    except Exception:
        # Fallback for jax builds where BlockSpec(pipeline_mode=pl.Buffered(1)) is
        # unsupported: identical kernel with default double-buffering.
        out = _build_and_call(False)

    return out[:M, :E].reshape(*lead, E)


# ---------------------------------------------------------------------------
# Init + smoke test
# ---------------------------------------------------------------------------

def init_params(key, embed_dim):
    """Deterministic init mimicking nn.Linear default (U(-1/sqrt(fan_in), ...))."""
    hidden = 4 * embed_dim
    k1, k2, k3, k4 = jax.random.split(key, 4)
    bnd1 = 1.0 / jnp.sqrt(embed_dim)
    bnd2 = 1.0 / jnp.sqrt(hidden)
    w1 = jax.random.uniform(k1, (embed_dim, hidden), jnp.float32, -bnd1, bnd1)
    b1 = jax.random.uniform(k2, (hidden,),           jnp.float32, -bnd1, bnd1)
    w2 = jax.random.uniform(k3, (hidden, embed_dim), jnp.float32, -bnd2, bnd2)
    b2 = jax.random.uniform(k4, (embed_dim,),        jnp.float32, -bnd2, bnd2)
    return w1, b1, w2, b2


def _bf16_reference(x, w1, b1, w2, b2):
    E = x.shape[-1]
    xf = x.reshape(-1, E)
    h = jnp.maximum(
        jnp.dot(xf.astype(jnp.bfloat16), w1.astype(jnp.bfloat16),
                preferred_element_type=jnp.float32) + b1, 0.0)
    out = jnp.dot(h.astype(jnp.bfloat16), w2.astype(jnp.bfloat16),
                  preferred_element_type=jnp.float32) + b2
    return out.reshape(x.shape)


if __name__ == "__main__":
    key = jax.random.PRNGKey(0)
    kx, kp = jax.random.split(key)

    # --- small shapes: batch=2, seq=8, embed_dim=32 (hidden=128) -> resident path
    B, T, E = 2, 8, 32
    x = jax.random.normal(kx, (B, T, E), jnp.float32)
    w1, b1, w2, b2 = init_params(kp, E)
    params = prepare_params(w1, b1, w2, b2)

    out = jax.block_until_ready(feed_forward(x, params))
    assert out.shape == (B, T, E)

    ref_f32 = (jnp.maximum(x.reshape(-1, E) @ w1 + b1, 0.0) @ w2 + b2).reshape(B, T, E)
    assert jnp.allclose(out, ref_f32, atol=5e-2, rtol=5e-2)          # bf16-MXU tolerance
    assert jnp.allclose(out, _bf16_reference(x, w1, b1, w2, b2), atol=5e-3, rtol=5e-3)

    # --- exercise the H-chunked (k-inner accumulation) path at small shapes too
    E2 = 64                                      # hidden=256, tile_h=128 -> 2 k-steps
    x2 = jax.random.normal(kx, (B, T, E2), jnp.float32)
    w1b, b1b, w2b, b2b = init_params(kp, E2)
    params2 = prepare_params(w1b, b1b, w2b, b2b)

    out2 = jax.block_until_ready(feed_forward(x2, params2, tile_h=128))
    assert out2.shape == (B, T, E2)
    assert jnp.allclose(out2, _bf16_reference(x2, w1b, b1b, w2b, b2b),
                        atol=5e-3, rtol=5e-3)

    print("KERNEL_OK")
</pallas_src>

<mosaic_0001>
module attributes {stable_mosaic.version = 11 : i64} {
  func.func @_ffn_kernel_resident(%arg0: i32, %arg1: memref<16x128xbf16, #tpu.memory_space<vmem>>, %arg2: memref<128x128xbf16, #tpu.memory_space<vmem>>, %arg3: memref<1x128xf32, #tpu.memory_space<vmem>>, %arg4: memref<128x128xbf16, #tpu.memory_space<vmem>>, %arg5: memref<1x128xf32, #tpu.memory_space<vmem>>, %arg6: memref<16x128xf32, #tpu.memory_space<vmem>>) attributes {dimension_semantics = [#tpu.dimension_semantics<parallel>], iteration_bounds = array<i64: 1>, scalar_prefetch = 0 : i64, scratch_operands = 0 : i64, tpu.core_type = #tpu.core_type<tc>, window_params = [{transform_indices = @transform_0, window_bounds = array<i64: 16, 128>}, {pipeline_mode = #tpu.pipeline_mode<synchronous>, transform_indices = @transform_1, window_bounds = array<i64: 128, 128>}, {pipeline_mode = #tpu.pipeline_mode<synchronous>, transform_indices = @transform_2, window_bounds = array<i64: 1, 128>}, {pipeline_mode = #tpu.pipeline_mode<synchronous>, transform_indices = @transform_3, window_bounds = array<i64: 128, 128>}, {pipeline_mode = #tpu.pipeline_mode<synchronous>, transform_indices = @transform_4, window_bounds = array<i64: 1, 128>}, {transform_indices = @transform_5, window_bounds = array<i64: 16, 128>}]} {
    %c0 = arith.constant 0 : index
    %c0_0 = arith.constant 0 : index
    %0 = vector.load %arg1[%c0, %c0_0] : memref<16x128xbf16, #tpu.memory_space<vmem>>, vector<16x128xbf16>
    %c0_1 = arith.constant 0 : index
    %c0_2 = arith.constant 0 : index
    %1 = vector.load %arg2[%c0_1, %c0_2] : memref<128x128xbf16, #tpu.memory_space<vmem>>, vector<128x128xbf16>
    %cst = arith.constant dense<0.000000e+00> : vector<16x128xf32>
    %2 = tpu.matmul %0, %1, %cst {dimension_numbers = #tpu.dot_dimension_numbers<[1], [0], [0], [1], [0, 0, 1, 1], [], []>} : vector<16x128xbf16>, vector<128x128xbf16>, vector<16x128xf32> -> vector<16x128xf32>
    %c0_3 = arith.constant 0 : index
    %c0_4 = arith.constant 0 : index
    %3 = vector.load %arg3[%c0_3, %c0_4] : memref<1x128xf32, #tpu.memory_space<vmem>>, vector<1x128xf32>
    %4 = vector.broadcast %3 : vector<1x128xf32> to vector<16x128xf32>
    %5 = arith.addf %2, %4 : vector<16x128xf32>
    %cst_5 = arith.constant 0.000000e+00 : f32
    %6 = vector.broadcast %cst_5 : f32 to vector<16x128xf32>
    %7 = arith.maximumf %5, %6 : vector<16x128xf32>
    %8 = arith.truncf %7 : vector<16x128xf32> to vector<16x128xbf16>
    %c0_6 = arith.constant 0 : index
    %c0_7 = arith.constant 0 : index
    %9 = vector.load %arg4[%c0_6, %c0_7] : memref<128x128xbf16, #tpu.memory_space<vmem>>, vector<128x128xbf16>
    %cst_8 = arith.constant dense<0.000000e+00> : vector<16x128xf32>
    %10 = tpu.matmul %8, %9, %cst_8 {dimension_numbers = #tpu.dot_dimension_numbers<[1], [0], [0], [1], [0, 0, 1, 1], [], []>} : vector<16x128xbf16>, vector<128x128xbf16>, vector<16x128xf32> -> vector<16x128xf32>
    %c0_9 = arith.constant 0 : index
    %c0_10 = arith.constant 0 : index
    %11 = vector.load %arg5[%c0_9, %c0_10] : memref<1x128xf32, #tpu.memory_space<vmem>>, vector<1x128xf32>
    %12 = vector.broadcast %11 : vector<1x128xf32> to vector<16x128xf32>
    %13 = arith.addf %10, %12 : vector<16x128xf32>
    %c0_11 = arith.constant 0 : index
    %c0_12 = arith.constant 0 : index
    %14 = vector.load %arg6[%c0_11, %c0_12] : memref<16x128xf32, #tpu.memory_space<vmem>>, vector<16x128xf32>
    tpu.vector_store %arg6[%c0_11, %c0_12], %13 {strides = array<i32>} : memref<16x128xf32, #tpu.memory_space<vmem>>, vector<16x128xf32>,
    return
  }
  func.func @transform_0(%arg0: i32) -> (i32, i32) {
    %c0_i32 = arith.constant 0 : i32
    %c0_i32_0 = arith.constant 0 : i32
    return %arg0, %c0_i32 : i32, i32
  }
  func.func @transform_1(%arg0: i32) -> (i32, i32) {
    %c0_i32 = arith.constant 0 : i32
    %c0_i32_0 = arith.constant 0 : i32
    %c0_i32_1 = arith.constant 0 : i32
    return %c0_i32, %c0_i32_0 : i32, i32
  }
  func.func @transform_2(%arg0: i32) -> (i32, i32) {
    %c0_i32 = arith.constant 0 : i32
    %c0_i32_0 = arith.constant 0 : i32
    %c0_i32_1 = arith.constant 0 : i32
    return %c0_i32, %c0_i32_0 : i32, i32
  }
  func.func @transform_3(%arg0: i32) -> (i32, i32) {
    %c0_i32 = arith.constant 0 : i32
    %c0_i32_0 = arith.constant 0 : i32
    %c0_i32_1 = arith.constant 0 : i32
    return %c0_i32, %c0_i32_0 : i32, i32
  }
  func.func @transform_4(%arg0: i32) -> (i32, i32) {
    %c0_i32 = arith.constant 0 : i32
    %c0_i32_0 = arith.constant 0 : i32
    %c0_i32_1 = arith.constant 0 : i32
    return %c0_i32, %c0_i32_0 : i32, i32
  }
  func.func @transform_5(%arg0: i32) -> (i32, i32) {
    %c0_i32 = arith.constant 0 : i32
    %c0_i32_0 = arith.constant 0 : i32
    return %arg0, %c0_i32 : i32, i32
  }
}

module attributes {stable_mosaic.version = 11 : i64} {
  func.func @_ffn_kernel_resident(%arg0: i32, %arg1: memref<16x128xbf16, #tpu.memory_space<vmem>>, %arg2: memref<128x128xbf16, #tpu.memory_space<vmem>>, %arg3: memref<1x128xf32, #tpu.memory_space<vmem>>, %arg4: memref<128x128xbf16, #tpu.memory_space<vmem>>, %arg5: memref<1x128xf32, #tpu.memory_space<vmem>>, %arg6: memref<16x128xf32, #tpu.memory_space<vmem>>) attributes {dimension_semantics = [#tpu.dimension_semantics<parallel>], iteration_bounds = array<i64: 1>, scalar_prefetch = 0 : i64, scratch_operands = 0 : i64, tpu.core_type = #tpu.core_type<tc>, window_params = [{transform_indices = @transform_0, window_bounds = array<i64: 16, 128>}, {pipeline_mode = #tpu.pipeline_mode<synchronous>, transform_indices = @transform_1, window_bounds = array<i64: 128, 128>}, {pipeline_mode = #tpu.pipeline_mode<synchronous>, transform_indices = @transform_2, window_bounds = array<i64: 1, 128>}, {pipeline_mode = #tpu.pipeline_mode<synchronous>, transform_indices = @transform_3, window_bounds = array<i64: 128, 128>}, {pipeline_mode = #tpu.pipeline_mode<synchronous>, transform_indices = @transform_4, window_bounds = array<i64: 1, 128>}, {transform_indices = @transform_5, window_bounds = array<i64: 16, 128>}]} {
    %c0 = arith.constant 0 : index
    %c0_0 = arith.constant 0 : index
    %0 = vector.load %arg1[%c0, %c0_0] : memref<16x128xbf16, #tpu.memory_space<vmem>>, vector<16x128xbf16>
    %c0_1 = arith.constant 0 : index
    %c0_2 = arith.constant 0 : index
    %1 = vector.load %arg2[%c0_1, %c0_2] : memref<128x128xbf16, #tpu.memory_space<vmem>>, vector<128x128xbf16>
    %cst = arith.constant dense<0.000000e+00> : vector<16x128xf32>
    %2 = tpu.matmul %0, %1, %cst {dimension_numbers = #tpu.dot_dimension_numbers<[1], [0], [0], [1], [0, 0, 1, 1], [], []>} : vector<16x128xbf16>, vector<128x128xbf16>, vector<16x128xf32> -> vector<16x128xf32>
    %c0_3 = arith.constant 0 : index
    %c0_4 = arith.constant 0 : index
    %3 = vector.load %arg3[%c0_3, %c0_4] : memref<1x128xf32, #tpu.memory_space<vmem>>, vector<1x128xf32>
    %4 = vector.broadcast %3 : vector<1x128xf32> to vector<16x128xf32>
    %5 = arith.addf %2, %4 : vector<16x128xf32>
    %cst_5 = arith.constant 0.000000e+00 : f32
    %6 = vector.broadcast %cst_5 : f32 to vector<16x128xf32>
    %7 = arith.maximumf %5, %6 : vector<16x128xf32>
    %8 = arith.truncf %7 : vector<16x128xf32> to vector<16x128xbf16>
    %c0_6 = arith.constant 0 : index
    %c0_7 = arith.constant 0 : index
    %9 = vector.load %arg4[%c0_6, %c0_7] : memref<128x128xbf16, #tpu.memory_space<vmem>>, vector<128x128xbf16>
    %cst_8 = arith.constant dense<0.000000e+00> : vector<16x128xf32>
    %10 = tpu.matmul %8, %9, %cst_8 {dimension_numbers = #tpu.dot_dimension_numbers<[1], [0], [0], [1], [0, 0, 1, 1], [], []>} : vector<16x128xbf16>, vector<128x128xbf16>, vector<16x128xf32> -> vector<16x128xf32>
    %c0_9 = arith.constant 0 : index
    %c0_10 = arith.constant 0 : index
    %11 = vector.load %arg5[%c0_9, %c0_10] : memref<1x128xf32, #tpu.memory_space<vmem>>, vector<1x128xf32>
    %12 = vector.broadcast %11 : vector<1x128xf32> to vector<16x128xf32>
    %13 = arith.addf %10, %12 : vector<16x128xf32>
    %c0_11 = arith.constant 0 : index
    %c0_12 = arith.constant 0 : index
    %14 = vector.load %arg6[%c0_11, %c0_12] : memref<16x128xf32, #tpu.memory_space<vmem>>, vector<16x128xf32>
    tpu.vector_store %arg6[%c0_11, %c0_12], %13 {strides = array<i32>} : memref<16x128xf32, #tpu.memory_space<vmem>>, vector<16x128xf32>,
    return
  }
  func.func @transform_0(%arg0: i32) -> (i32, i32) {
    %c0_i32 = arith.constant 0 : i32
    %c0_i32_0 = arith.constant 0 : i32
    return %arg0, %c0_i32 : i32, i32
  }
  func.func @transform_1(%arg0: i32) -> (i32, i32) {
    %c0_i32 = arith.constant 0 : i32
    %c0_i32_0 = arith.constant 0 : i32
    %c0_i32_1 = arith.constant 0 : i32
    return %c0_i32, %c0_i32_0 : i32, i32
  }
  func.func @transform_2(%arg0: i32) -> (i32, i32) {
    %c0_i32 = arith.constant 0 : i32
    %c0_i32_0 = arith.constant 0 : i32
    %c0_i32_1 = arith.constant 0 : i32
    return %c0_i32, %c0_i32_0 : i32, i32
  }
  func.func @transform_3(%arg0: i32) -> (i32, i32) {
    %c0_i32 = arith.constant 0 : i32
    %c0_i32_0 = arith.constant 0 : i32
    %c0_i32_1 = arith.constant 0 : i32
    return %c0_i32, %c0_i32_0 : i32, i32
  }
  func.func @transform_4(%arg0: i32) -> (i32, i32) {
    %c0_i32 = arith.constant 0 : i32
    %c0_i32_0 = arith.constant 0 : i32
    %c0_i32_1 = arith.constant 0 : i32
    return %c0_i32, %c0_i32_0 : i32, i32
  }
  func.func @transform_5(%arg0: i32) -> (i32, i32) {
    %c0_i32 = arith.constant 0 : i32
    %c0_i32_0 = arith.constant 0 : i32
    return %arg0, %c0_i32 : i32, i32
  }
}

</mosaic_0001>

<bundles_post_ra>
// kernel: tpu_custom_call.1
= control target key start
LH: loop header
LB: loop body
LE: loop exit
PB: predicated region body
PF: predicated region fallthrough
CT: control target
= control target key end

     0   :  { %10 = vsyncpa [#allocation3], 0  ;;  %s518_s0 = inlined_call_operand.hbm [shape: bf16[16,128], index: 0, kind: input, shape index: {}]   ;;  %s519_s1 = inlined_call_operand.hbm [shape: bf16[128,128], index: 1, kind: input, shape index: {}]   ;;  %s520_s2 = inlined_call_operand.vmem [shape: f32[1,128], index: 2, kind: input, shape index: {}]   ;;  %s521_s3 = inlined_call_operand.hbm [shape: bf16[128,128], index: 3, kind: input, shape index: {}]   ;;  %s522_s4 = inlined_call_operand.vmem [shape: f32[1,128], index: 4, kind: input, shape index: {}]   ;;  %s523_s5 = inlined_call_operand.hbm [shape: f32[16,128], index: 5, kind: output, shape index: {}]  }
   0x1   :  { %11 = vsyncpa [#allocation6], 0 }
   0x2   :  { %12 = vsyncpa [#allocation4], 0  ;;  %s30_s20 = sshll.u32 %s519_s1, 4  ;;  %s462_s21 = smov [#allocation5]   ;;  %s31_s20 = int_to_ptr.hbm [resolvable:$true] %s30_s20 }
   0x3   :  { %s32_s22 = sshll.u32 %s462_s21, 4  ;;  %s17_s25 = sshll.u32 %s518_s0, 4  ;;  %s33_s22 = int_to_ptr.vmem [resolvable:$true] %s32_s22  ;;  %s18_s25 = int_to_ptr.hbm [resolvable:$true] %s17_s25 }
   0x4   :  { %s463_s26 = smov 64   ;;  %s464_s27 = smov 4  }
   0x5   :  { %38 = dma.hbm_to_vmem [thread:$0]  %s31_s20, 1024, %s33_s22, [#allocation6], %s463_s26, %s463_s26, %s464_s27  }
   0x6   :  { %s465_s28 = smov [#allocation2]   ;;  %s45_s7 = sshll.u32 %s521_s3, 4  ;;  %s46_s7 = int_to_ptr.hbm [resolvable:$true] %s45_s7 }
   0x7   :  { %s19_s29 = sshll.u32 %s465_s28, 4  ;;  %s466_s1 = smov [#allocation7]   ;;  %s20_s29 = int_to_ptr.vmem [resolvable:$true] %s19_s29 }
   0x8   :  { %25 = dma.hbm_to_vmem [thread:$0]  %s18_s25, 128, %s20_s29, [#allocation3], %s463_s26, %s463_s26, %s464_s27  }
   0x9   :  { %s47_s8 = sshll.u32 %s466_s1, 4  ;;  %s48_s8 = int_to_ptr.vmem [resolvable:$true] %s47_s8 }
   0xa   :  { %53 = dma.hbm_to_vmem [thread:$0]  %s46_s7, 1024, %s48_s8, [#allocation6], %s463_s26, %s463_s26, %s464_s27  }
   0xb   :  { %456 = dma.done.wait [#allocation3], 128  }
   0xc   :  { %457 = vsyncadd [#allocation3], 4294967168 }
   0xd   :  { %458 = dma.done.wait [#allocation6], 2048  }
   0xe   :  { %459 = vsyncadd [#allocation6], 4294965248  ;;  %v341_v0 = vld [vmem:[#allocation5 + $0x38] sm:$0xff]  ;;  %v340_v1 = vld [vmem:[#allocation5 + $0x30] sm:$0xff]  ;;  %s467_s11 = smov [#allocation8]   ;;  %s468_s15 = smov 128  }
   0xf   :  { %144 = vmatpush.bf16.msra.mxu0 %v341_v0  ;;  %v349_v2 = vld [vmem:[#allocation7 + $0x38] sm:$0xff]  ;;  %v348_v3 = vld [vmem:[#allocation7 + $0x30] sm:$0xff]  ;;  %v339_v4 = vld [vmem:[#allocation5 + $0x28] sm:$0xff]  ;;  %s249_s12 = sshll.u32 %s467_s11, 4  ;;  %s469_s16 = smov 8   ;;  %s250_s12 = int_to_ptr.vmem [resolvable:$true] %s249_s12 }
  0x10   :  { %229 = vmatpush.bf16.msra.mxu1 %v349_v2  ;;  %v347_v5 = vld [vmem:[#allocation7 + $0x28] sm:$0xff]  ;;  %v338_v6 = vld [vmem:[#allocation5 + $0x20] sm:$0xff]  ;;  %v337_v8 = vld [vmem:[#allocation5 + $0x18] sm:$0xff] }
  0x11   :  { %v346_v7 = vld [vmem:[#allocation7 + $0x20] sm:$0xff]  ;;  %v336_v9 = vld [vmem:[#allocation5 + $0x10] sm:$0xff]  ;;  %v335_v10 = vld [vmem:[#allocation5 + $0x8] sm:$0xff] }
  0x12   :  { %v334_v11 = vld [vmem:[#allocation5] sm:$0xff]  ;;  %v333_v12 = vld [vmem:[#allocation2] sm:$0xff]  ;;  %v344_v14 = vld [vmem:[#allocation7 + $0x10] sm:$0xff] }
  0x13   :  { %145 = vmatpush.bf16.msra.mxu0 %v340_v1  ;;  %v345_v13 = vld [vmem:[#allocation7 + $0x18] sm:$0xff]  ;;  %v343_v15 = vld [vmem:[#allocation7 + $0x8] sm:$0xff]  ;;  %v342_v16 = vld [vmem:[#allocation7] sm:$0xff] }
  0x14   :  { %230 = vmatpush.bf16.msra.mxu1 %v348_v3  ;;  %v358_v18 = vld [vmem:[%s520_s2] ss:$0 sm:$0xff]  ;;  %s251_s2 = sshll.u32 %s523_s5, 4  ;;  %s252_s2 = int_to_ptr.hbm [resolvable:$true] %s251_s2 }
  0x15   :  { %v359_v25 = vld [vmem:[%s522_s4] ss:$0 sm:$0xff] }
  0x17   :  { %146 = vmatpush.bf16.msra.mxu0 %v339_v4 }
  0x18   :  { %231 = vmatpush.bf16.msra.mxu1 %v347_v5 }
  0x1b   :  { %147 = vmatpush.bf16.msra.mxu0 %v338_v6 }
  0x1c   :  { %232 = vmatpush.bf16.msra.mxu1 %v346_v7 }
  0x1f   :  { %148 = vmatpush.bf16.msra.mxu0 %v337_v8 }
  0x20   :  { %233 = vmatpush.bf16.msra.mxu1 %v345_v13 }
  0x23   :  { %149 = vmatpush.bf16.msra.mxu0 %v336_v9 }
  0x24   :  { %234 = vmatpush.bf16.msra.mxu1 %v344_v14 }
  0x27   :  { %150 = vmatpush.bf16.msra.mxu0 %v335_v10 }
  0x28   :  { %235 = vmatpush.bf16.msra.mxu1 %v343_v15 }
  0x2b   :  { %151 = vmatpush.bf16.msra.mxu0 %v334_v11 }
  0x2c   :  { %236 = vmatpush.bf16.msra.mxu1 %v342_v16 }
  0x2e   :  { %152 = vmatmul.bf16.vlgmr.msra.gmra.mxu0 %v333_v12 }
  0xab   :  { %v153_v17 = vpop.f32.mrf.mxu0 }
  0xac   :  { %v154_v19 = vadd.f32 %v358_v18, %v153_v17 }
  0xae   :  { %v158_v22 = vmax.f32 %v154_v19, 0.0 }
  0xb3   :  { %v155_v20 = vpop.f32.mrf.mxu0 }
  0xb4   :  { %v156_v21 = vadd.f32 %v358_v18, %v155_v20 }
  0xb6   :  { %v159_v23 = vmax.f32 %v156_v21, 0.0 }
  0xb8   :  { %v160_v24 = vpack.c.bf16 %v159_v23, %v158_v22 }
  0xba   :  { %237 = vmatmul.bf16.vlgmr.msra.gmra.mxu1 %v160_v24 }
 0x137   :  { %v238_v26 = vpop.f32.mrf.mxu1 }
 0x138   :  { %v239_v27 = vadd.f32 %v359_v25, %v238_v26 }
 0x13a   :  { %243 = vst [vmem:[#allocation8] sm:$0xff] %v239_v27 }
 0x13f   :  { %v240_v28 = vpop.f32.mrf.mxu1 }
 0x140   :  { %v241_v29 = vadd.f32 %v359_v25, %v240_v28 }
 0x142   :  { %244 = vst [vmem:[#allocation8 + $0x8] sm:$0xff] %v241_v29 }
 0x143   :  { %257 = dma.vmem_to_hbm [thread:$0]  %s250_s12, 256, %s252_s2, [#allocation4], %s468_s15, %s468_s15, %s469_s16  }
 0x144   :  { %460 = dma.done.wait [#allocation4], 256  }
 0x145   :  { %461 = vsyncadd [#allocation4], 4294967040 }
 0x146   :  { %262 = vsyncpa [#allocation3], 1 }
 0x147   :  { %263 = vsyncpa [#allocation6], 1 }
 0x148   :  { %264 = vsyncpa [#allocation4], 1 }

// kernel: tpu_custom_call.1
= control target key start
LH: loop header
LB: loop body
LE: loop exit
PB: predicated region body
PF: predicated region fallthrough
CT: control target
= control target key end

     0   :  { %10 = vsyncpa [#allocation3], 0  ;;  %s518_s0 = inlined_call_operand.hbm [shape: bf16[16,128], index: 0, kind: input, shape index: {}]   ;;  %s519_s1 = inlined_call_operand.hbm [shape: bf16[128,128], index: 1, kind: input, shape index: {}]   ;;  %s520_s2 = inlined_call_operand.vmem [shape: f32[1,128], index: 2, kind: input, shape index: {}]   ;;  %s521_s3 = inlined_call_operand.hbm [shape: bf16[128,128], index: 3, kind: input, shape index: {}]   ;;  %s522_s4 = inlined_call_operand.vmem [shape: f32[1,128], index: 4, kind: input, shape index: {}]   ;;  %s523_s5 = inlined_call_operand.hbm [shape: f32[16,128], index: 5, kind: output, shape index: {}]  }
   0x1   :  { %11 = vsyncpa [#allocation6], 0 }
   0x2   :  { %12 = vsyncpa [#allocation4], 0  ;;  %s30_s20 = sshll.u32 %s519_s1, 4  ;;  %s462_s21 = smov [#allocation5]   ;;  %s31_s20 = int_to_ptr.hbm [resolvable:$true] %s30_s20 }
   0x3   :  { %s32_s22 = sshll.u32 %s462_s21, 4  ;;  %s17_s25 = sshll.u32 %s518_s0, 4  ;;  %s33_s22 = int_to_ptr.vmem [resolvable:$true] %s32_s22  ;;  %s18_s25 = int_to_ptr.hbm [resolvable:$true] %s17_s25 }
   0x4   :  { %s463_s26 = smov 64   ;;  %s464_s27 = smov 4  }
   0x5   :  { %38 = dma.hbm_to_vmem [thread:$0]  %s31_s20, 1024, %s33_s22, [#allocation6], %s463_s26, %s463_s26, %s464_s27  }
   0x6   :  { %s465_s28 = smov [#allocation2]   ;;  %s45_s7 = sshll.u32 %s521_s3, 4  ;;  %s46_s7 = int_to_ptr.hbm [resolvable:$true] %s45_s7 }
   0x7   :  { %s19_s29 = sshll.u32 %s465_s28, 4  ;;  %s466_s1 = smov [#allocation7]   ;;  %s20_s29 = int_to_ptr.vmem [resolvable:$true] %s19_s29 }
   0x8   :  { %25 = dma.hbm_to_vmem [thread:$0]  %s18_s25, 128, %s20_s29, [#allocation3], %s463_s26, %s463_s26, %s464_s27  }
   0x9   :  { %s47_s8 = sshll.u32 %s466_s1, 4  ;;  %s48_s8 = int_to_ptr.vmem [resolvable:$true] %s47_s8 }
   0xa   :  { %53 = dma.hbm_to_vmem [thread:$0]  %s46_s7, 1024, %s48_s8, [#allocation6], %s463_s26, %s463_s26, %s464_s27  }
   0xb   :  { %456 = dma.done.wait [#allocation3], 128  }
   0xc   :  { %457 = vsyncadd [#allocation3], 4294967168 }
   0xd   :  { %458 = dma.done.wait [#allocation6], 2048  }
   0xe   :  { %459 = vsyncadd [#allocation6], 4294965248  ;;  %v341_v0 = vld [vmem:[#allocation5 + $0x38] sm:$0xff]  ;;  %v340_v1 = vld [vmem:[#allocation5 + $0x30] sm:$0xff]  ;;  %s467_s11 = smov [#allocation8]   ;;  %s468_s15 = smov 128  }
   0xf   :  { %144 = vmatpush.bf16.msra.mxu0 %v341_v0  ;;  %v349_v2 = vld [vmem:[#allocation7 + $0x38] sm:$0xff]  ;;  %v348_v3 = vld [vmem:[#allocation7 + $0x30] sm:$0xff]  ;;  %v339_v4 = vld [vmem:[#allocation5 + $0x28] sm:$0xff]  ;;  %s249_s12 = sshll.u32 %s467_s11, 4  ;;  %s469_s16 = smov 8   ;;  %s250_s12 = int_to_ptr.vmem [resolvable:$true] %s249_s12 }
  0x10   :  { %229 = vmatpush.bf16.msra.mxu1 %v349_v2  ;;  %v347_v5 = vld [vmem:[#allocation7 + $0x28] sm:$0xff]  ;;  %v338_v6 = vld [vmem:[#allocation5 + $0x20] sm:$0xff]  ;;  %v337_v8 = vld [vmem:[#allocation5 + $0x18] sm:$0xff] }
  0x11   :  { %v346_v7 = vld [vmem:[#allocation7 + $0x20] sm:$0xff]  ;;  %v336_v9 = vld [vmem:[#allocation5 + $0x10] sm:$0xff]  ;;  %v335_v10 = vld [vmem:[#allocation5 + $0x8] sm:$0xff] }
  0x12   :  { %v334_v11 = vld [vmem:[#allocation5] sm:$0xff]  ;;  %v333_v12 = vld [vmem:[#allocation2] sm:$0xff]  ;;  %v344_v14 = vld [vmem:[#allocation7 + $0x10] sm:$0xff] }
  0x13   :  { %145 = vmatpush.bf16.msra.mxu0 %v340_v1  ;;  %v345_v13 = vld [vmem:[#allocation7 + $0x18] sm:$0xff]  ;;  %v343_v15 = vld [vmem:[#allocation7 + $0x8] sm:$0xff]  ;;  %v342_v16 = vld [vmem:[#allocation7] sm:$0xff] }
  0x14   :  { %230 = vmatpush.bf16.msra.mxu1 %v348_v3  ;;  %v358_v18 = vld [vmem:[%s520_s2] ss:$0 sm:$0xff]  ;;  %s251_s2 = sshll.u32 %s523_s5, 4  ;;  %s252_s2 = int_to_ptr.hbm [resolvable:$true] %s251_s2 }
  0x15   :  { %v359_v25 = vld [vmem:[%s522_s4] ss:$0 sm:$0xff] }
  0x17   :  { %146 = vmatpush.bf16.msra.mxu0 %v339_v4 }
  0x18   :  { %231 = vmatpush.bf16.msra.mxu1 %v347_v5 }
  0x1b   :  { %147 = vmatpush.bf16.msra.mxu0 %v338_v6 }
  0x1c   :  { %232 = vmatpush.bf16.msra.mxu1 %v346_v7 }
  0x1f   :  { %148 = vmatpush.bf16.msra.mxu0 %v337_v8 }
  0x20   :  { %233 = vmatpush.bf16.msra.mxu1 %v345_v13 }
  0x23   :  { %149 = vmatpush.bf16.msra.mxu0 %v336_v9 }
  0x24   :  { %234 = vmatpush.bf16.msra.mxu1 %v344_v14 }
  0x27   :  { %150 = vmatpush.bf16.msra.mxu0 %v335_v10 }
  0x28   :  { %235 = vmatpush.bf16.msra.mxu1 %v343_v15 }
  0x2b   :  { %151 = vmatpush.bf16.msra.mxu0 %v334_v11 }
  0x2c   :  { %236 = vmatpush.bf16.msra.mxu1 %v342_v16 }
  0x2e   :  { %152 = vmatmul.bf16.vlgmr.msra.gmra.mxu0 %v333_v12 }
  0xab   :  { %v153_v17 = vpop.f32.mrf.mxu0 }
  0xac   :  { %v154_v19 = vadd.f32 %v358_v18, %v153_v17 }
  0xae   :  { %v158_v22 = vmax.f32 %v154_v19, 0.0 }
  0xb3   :  { %v155_v20 = vpop.f32.mrf.mxu0 }
  0xb4   :  { %v156_v21 = vadd.f32 %v358_v18, %v155_v20 }
  0xb6   :  { %v159_v23 = vmax.f32 %v156_v21, 0.0 }
  0xb8   :  { %v160_v24 = vpack.c.bf16 %v159_v23, %v158_v22 }
  0xba   :  { %237 = vmatmul.bf16.vlgmr.msra.gmra.mxu1 %v160_v24 }
 0x137   :  { %v238_v26 = vpop.f32.mrf.mxu1 }
 0x138   :  { %v239_v27 = vadd.f32 %v359_v25, %v238_v26 }
 0x13a   :  { %243 = vst [vmem:[#allocation8] sm:$0xff] %v239_v27 }
 0x13f   :  { %v240_v28 = vpop.f32.mrf.mxu1 }
 0x140   :  { %v241_v29 = vadd.f32 %v359_v25, %v240_v28 }
 0x142   :  { %244 = vst [vmem:[#allocation8 + $0x8] sm:$0xff] %v241_v29 }
 0x143   :  { %257 = dma.vmem_to_hbm [thread:$0]  %s250_s12, 256, %s252_s2, [#allocation4], %s468_s15, %s468_s15, %s469_s16  }
 0x144   :  { %460 = dma.done.wait [#allocation4], 256  }
 0x145   :  { %461 = vsyncadd [#allocation4], 4294967040 }
 0x146   :  { %262 = vsyncpa [#allocation3], 1 }
 0x147   :  { %263 = vsyncpa [#allocation6], 1 }
 0x148   :  { %264 = vsyncpa [#allocation4], 1 }

</bundles_post_ra>
